<compile_context>
chip_gen: v5e
topology: v5e:2x2
jax: 0.10.0
libtpu: 0.0.40
codegen_flags: <defaults>
</compile_context>

<pallas_src>
import functools

import jax
import jax.numpy as jnp
from jax import lax
from jax.experimental import pallas as pl
from jax.experimental.pallas import tpu as pltpu


def spatial_attention_kernel(r_ref, x_ref, o_ref, acc_ref, *, ks):
    # r_ref  : VMEM (2, ks, Wp, W)  f32   banded conv matrices (avg block has 1/C folded in)
    # x_ref  : VMEM (b_blk, c_blk, H, W)  input block, streamed unpadded
    # o_ref  : VMEM (b_blk, 1, H, W) f32  sigmoid(conv) output block
    # acc_ref: VMEM (b_blk, 2, Hp, Wp) f32  zero-padded channel-sum / channel-max maps
    ic = pl.program_id(1)            # channel-tile step (reduction axis, last in grid)
    nc = pl.num_programs(1)
    b_blk, c_blk = x_ref.shape[0], x_ref.shape[1]
    H, W = o_ref.shape[2], o_ref.shape[3]
    pad = ks // 2

    # Zero the padded pooled maps once per image block: the untouched border rows
    # / columns implement the conv's zero padding without ever padding x in HBM.
    @pl.when(ic == 0)
    def _():
        acc_ref[...] = jnp.zeros_like(acc_ref)

    # ---- channel pooling: one fused pass (sum + max) over this channel tile ----
    @pl.loop(0, b_blk)
    def _(b):
        def chan_body(c, carry):
            s, m = carry
            xc = x_ref[b, c].astype(jnp.float32)          # (H, W), read once
            return s + xc, jnp.maximum(m, xc)

        s, m = lax.fori_loop(
            0, c_blk, chan_body,
            (jnp.zeros((H, W), jnp.float32),
             jnp.full((H, W), -jnp.inf, jnp.float32)),
            unroll=c_blk <= 16)

        @pl.when(ic == 0)
        def _():
            acc_ref[b, 0, pl.ds(pad, H), pl.ds(pad, W)] = s
            acc_ref[b, 1, pl.ds(pad, H), pl.ds(pad, W)] = m

        @pl.when(ic > 0)
        def _():
            acc_ref[b, 0, pl.ds(pad, H), pl.ds(pad, W)] += s
            acc_ref[b, 1, pl.ds(pad, H), pl.ds(pad, W)] = jnp.maximum(
                acc_ref[b, 1, pl.ds(pad, H), pl.ds(pad, W)], m)

    # ---- epilogue: KSxKS conv as 2*KS small MXU matmuls, then sigmoid ----
    # out[i, :] = sum_{ch, ki} padded_map[ch][i+ki, :] @ R[ch, ki]
    @pl.when(ic == nc - 1)
    def _():
        @pl.loop(0, b_blk)
        def _(b):
            acc = jnp.zeros((H, W), jnp.float32)
            for ch in range(2):                 # 0: channel-sum (avg), 1: channel-max
                for ki in range(ks):            # row taps: sublane-offset reads only
                    lhs = acc_ref[b, ch, pl.ds(ki, H), :]          # (H, Wp)
                    acc = acc + jnp.dot(lhs, r_ref[ch, ki],
                                        preferred_element_type=jnp.float32)
            o_ref[b, 0] = jax.nn.sigmoid(acc).astype(o_ref.dtype)


def _round_up(x, m):
    return (x + m - 1) // m * m


def _vmem_budget():
    # Per-core physical VMEM differs by generation (v5e/v6e: 128 MiB, v7x: 64 MiB).
    try:
        cap = pltpu.get_tpu_info().vmem_capacity_bytes
    except Exception:
        cap = 64 * 1024 * 1024                  # conservative fallback (v7x size)
    return int(cap * 0.6), int(cap * 0.8)       # (block budget, vmem_limit_bytes)


def _choose_blocks(N, C, H, W, ks, budget_bytes):
    pad = ks // 2
    Hp, Wp = H + 2 * pad, W + 2 * pad
    H_s, Hp_s = _round_up(H, 8), _round_up(Hp, 8)
    W_l, Wp_l = _round_up(W, 128), _round_up(Wp, 128)

    def vmem_bytes(b_blk, c_blk):
        inp = 2 * b_blk * c_blk * H_s * W_l * 4         # double-buffered input block
        out = 2 * b_blk * H_s * W_l * 4                 # double-buffered output block
        acc = b_blk * 2 * Hp_s * Wp_l * 4               # persistent accumulator scratch
        wts = 2 * 2 * ks * _round_up(Wp, 8) * W_l * 4   # resident banded conv matrices
        return inp + out + acc + wts

    # Batch block: amortize ~0.35us/step overhead, but keep >= 2 steps on the
    # "parallel" batch axis when N > 1 so dual-TC parts (v7x) get work on both cores.
    b_blk = max(1, min(8, N // 2)) if N > 1 else 1
    while N % b_blk:
        b_blk -= 1
    while b_blk > 1 and vmem_bytes(b_blk, 1) > budget_bytes:
        b_blk -= 1
        while N % b_blk:
            b_blk -= 1

    # Channel tile: largest divisor of C that fits the VMEM budget.
    c_blk = C
    while c_blk > 1 and (C % c_blk or vmem_bytes(b_blk, c_blk) > budget_bytes):
        c_blk -= 1
    return b_blk, c_blk


def spatial_attention(x, weight):
    """x: (N, C, H, W), weight: (1, 2, KS, KS) f32 -> (N, 1, H, W) f32."""
    N, C, H, W = x.shape
    ks = weight.shape[-1]
    assert ks in (3, 7) and weight.shape == (1, 2, ks, ks)
    pad = ks // 2
    Hp, Wp = H + 2 * pad, W + 2 * pad

    # Banded RHS matrices: R[ch, ki][j + kj, j] = w[ch, ki, kj], so that
    # padded_map[ch][i+ki, :] @ R[ch, ki] sums w[ch,ki,kj]*padded[i+ki, j+kj] over kj.
    # The 1/C of the channel mean is folded into the avg-channel block.
    w = weight.astype(jnp.float32).reshape(2, ks, ks)
    w = w.at[0].multiply(1.0 / C)
    jprime = jnp.arange(Wp)[:, None]
    j = jnp.arange(W)[None, :]
    kj = jprime - j
    valid = (kj >= 0) & (kj < ks)
    r = jnp.where(valid[None, None, :, :],
                  w[:, :, jnp.clip(kj, 0, ks - 1)], 0.0)        # (2, ks, Wp, W)

    block_budget, vmem_limit = _vmem_budget()
    b_blk, c_blk = _choose_blocks(N, C, H, W, ks, block_budget)
    grid = (N // b_blk, C // c_blk)         # channel (reduction) axis last

    # TODO(synk): when N // b_blk < 2 on dual-TC parts (v7x), add a second
    # "parallel" grid axis over row blocks of H (with KS-1 halo rows) for 2-core use.
    out = pl.pallas_call(
        functools.partial(spatial_attention_kernel, ks=ks),
        out_shape=jax.ShapeDtypeStruct((N, 1, H, W), jnp.float32),
        grid_spec=pltpu.PrefetchScalarGridSpec(
            num_scalar_prefetch=0,
            grid=grid,
            in_specs=[
                pl.BlockSpec((2, ks, Wp, W), lambda ib, ic: (0, 0, 0, 0)),
                pl.BlockSpec((b_blk, c_blk, H, W), lambda ib, ic: (ib, ic, 0, 0)),
            ],
            out_specs=pl.BlockSpec((b_blk, 1, H, W), lambda ib, ic: (ib, 0, 0, 0)),
            scratch_shapes=[
                pltpu.VMEM((b_blk, 2, Hp, Wp), jnp.float32),   # sum/max accumulators
            ],
        ),
        compiler_params=pltpu.CompilerParams(
            dimension_semantics=("parallel", "arbitrary"),
            vmem_limit_bytes=vmem_limit),
    )(r, x)
    return out


def _reference(x, weight):
    """Pure-JAX reference mirroring the PyTorch forward."""
    ks = weight.shape[-1]
    pad = ks // 2
    avg = jnp.mean(x, axis=1, keepdims=True)
    mx = jnp.max(x, axis=1, keepdims=True)
    cat = jnp.concatenate([avg, mx], axis=1)            # (N, 2, H, W)
    y = jax.lax.conv_general_dilated(
        cat, weight,
        window_strides=(1, 1),
        padding=((pad, pad), (pad, pad)),
        dimension_numbers=("NCHW", "OIHW", "NCHW"))
    return jax.nn.sigmoid(y)


if __name__ == "__main__":
    key = jax.random.PRNGKey(0)
    kx, kw = jax.random.split(key)

    N, C, H, W = 2, 4, 16, 16
    KS = 7
    x = jax.random.normal(kx, (N, C, H, W), dtype=jnp.float32)

    # Deterministic conv1 weight init: uniform(-1/sqrt(fan_in), 1/sqrt(fan_in)),
    # fan_in = 2*KS*KS (PyTorch's default Conv2d init bound).
    fan_in = 2 * KS * KS
    bound = 1.0 / (fan_in ** 0.5)
    weight = jax.random.uniform(kw, (1, 2, KS, KS), minval=-bound, maxval=bound,
                                dtype=jnp.float32)

    out = jax.block_until_ready(spatial_attention(x, weight))
    ref = _reference(x, weight)
    assert out.shape == (N, 1, H, W)
    assert jnp.allclose(out, ref, atol=3e-5, rtol=3e-5), "mismatch vs reference"

    print("KERNEL_OK")
</pallas_src>

<mosaic_0001>
module attributes {stable_mosaic.version = 11 : i64} {
  func.func @spatial_attention_kernel(%arg0: i32, %arg1: i32, %arg2: memref<2x7x22x16xf32, #tpu.memory_space<vmem>>, %arg3: memref<1x4x16x16xf32, #tpu.memory_space<vmem>>, %arg4: memref<1x1x16x16xf32, #tpu.memory_space<vmem>>, %arg5: memref<1x2x22x22xf32, #tpu.memory_space<vmem>>) attributes {dimension_semantics = [#tpu.dimension_semantics<parallel>, #tpu.dimension_semantics<arbitrary>], iteration_bounds = array<i64: 2, 1>, scalar_prefetch = 0 : i64, scratch_operands = 1 : i64, tpu.core_type = #tpu.core_type<tc>, window_params = [{pipeline_mode = #tpu.pipeline_mode<synchronous>, transform_indices = @transform_0, window_bounds = array<i64: 2, 7, 22, 16>}, {transform_indices = @transform_1, window_bounds = array<i64: 1, 4, 16, 16>}, {transform_indices = @transform_2, window_bounds = array<i64: 1, 1, 16, 16>}]} {
    %c0_i32 = arith.constant 0 : i32
    %0 = arith.cmpi eq, %arg1, %c0_i32 : i32
    %1 = arith.extui %0 : i1 to i32
    %c0_i32_0 = arith.constant 0 : i32
    %2 = arith.cmpi ne, %1, %c0_i32_0 : i32
    scf.if %2 {
      %cst_20 = arith.constant 0.000000e+00 : f32
      %40 = vector.broadcast %cst_20 : f32 to vector<1x2x22x22xf32>
      %c0_21 = arith.constant 0 : index
      %c0_22 = arith.constant 0 : index
      %c0_23 = arith.constant 0 : index
      %c0_24 = arith.constant 0 : index
      %41 = vector.load %arg5[%c0_21, %c0_22, %c0_23, %c0_24] : memref<1x2x22x22xf32, #tpu.memory_space<vmem>>, vector<1x2x22x22xf32>
      tpu.vector_store %arg5[%c0_21, %c0_22, %c0_23, %c0_24], %40 {strides = array<i32>} : memref<1x2x22x22xf32, #tpu.memory_space<vmem>>, vector<1x2x22x22xf32>,
    } else {
    }
    %c0_i32_1 = arith.constant 0 : i32
    %c1_i32 = arith.constant 1 : i32
    %3 = arith.muli %c0_i32_1, %c1_i32 : i32
    %c0_i32_2 = arith.constant 0 : i32
    %4 = arith.addi %c0_i32_2, %3 : i32
    %cst = arith.constant 0.000000e+00 : f32
    %5 = vector.broadcast %cst : f32 to vector<16x16xf32>
    %cst_3 = arith.constant 0xFF800000 : f32
    %6 = vector.broadcast %cst_3 : f32 to vector<16x16xf32>
    %c0_i32_4 = arith.constant 0 : i32
    %7 = arith.index_cast %4 : i32 to index
    %8 = arith.index_cast %c0_i32_4 : i32 to index
    %c0 = arith.constant 0 : index
    %c0_5 = arith.constant 0 : index
    %9 = vector.load %arg3[%7, %8, %c0, %c0_5] : memref<1x4x16x16xf32, #tpu.memory_space<vmem>>, vector<1x1x16x16xf32>
    %10 = vector.shape_cast %9 : vector<1x1x16x16xf32> to vector<16x16xf32>
    %11 = arith.addf %5, %10 : vector<16x16xf32>
    %12 = arith.maximumf %6, %10 : vector<16x16xf32>
    %c1_i32_6 = arith.constant 1 : i32
    %13 = arith.index_cast %4 : i32 to index
    %14 = arith.index_cast %c1_i32_6 : i32 to index
    %c0_7 = arith.constant 0 : index
    %c0_8 = arith.constant 0 : index
    %15 = vector.load %arg3[%13, %14, %c0_7, %c0_8] : memref<1x4x16x16xf32, #tpu.memory_space<vmem>>, vector<1x1x16x16xf32>
    %16 = vector.shape_cast %15 : vector<1x1x16x16xf32> to vector<16x16xf32>
    %17 = arith.addf %11, %16 : vector<16x16xf32>
    %18 = arith.maximumf %12, %16 : vector<16x16xf32>
    %c2_i32 = arith.constant 2 : i32
    %19 = arith.index_cast %4 : i32 to index
    %20 = arith.index_cast %c2_i32 : i32 to index
    %c0_9 = arith.constant 0 : index
    %c0_10 = arith.constant 0 : index
    %21 = vector.load %arg3[%19, %20, %c0_9, %c0_10] : memref<1x4x16x16xf32, #tpu.memory_space<vmem>>, vector<1x1x16x16xf32>
    %22 = vector.shape_cast %21 : vector<1x1x16x16xf32> to vector<16x16xf32>
    %23 = arith.addf %17, %22 : vector<16x16xf32>
    %24 = arith.maximumf %18, %22 : vector<16x16xf32>
    %c3_i32 = arith.constant 3 : i32
    %25 = arith.index_cast %4 : i32 to index
    %26 = arith.index_cast %c3_i32 : i32 to index
    %c0_11 = arith.constant 0 : index
    %c0_12 = arith.constant 0 : index
    %27 = vector.load %arg3[%25, %26, %c0_11, %c0_12] : memref<1x4x16x16xf32, #tpu.memory_space<vmem>>, vector<1x1x16x16xf32>
    %28 = vector.shape_cast %27 : vector<1x1x16x16xf32> to vector<16x16xf32>
    %29 = arith.addf %23, %28 : vector<16x16xf32>
    %30 = arith.maximumf %24, %28 : vector<16x16xf32>
    %c4_i32 = arith.constant 4 : i32
    %c0_i32_13 = arith.constant 0 : i32
    %31 = arith.cmpi eq, %arg1, %c0_i32_13 : i32
    %32 = arith.extui %31 : i1 to i32
    %c0_i32_14 = arith.constant 0 : i32
    %33 = arith.cmpi ne, %32, %c0_i32_14 : i32
    scf.if %33 {
      %40 = arith.index_cast %4 : i32 to index
      %c0_20 = arith.constant 0 : index
      %c3 = arith.constant 3 : index
      %c3_21 = arith.constant 3 : index
      %41 = vector.load %arg5[%40, %c0_20, %c3, %c3_21] : memref<1x2x22x22xf32, #tpu.memory_space<vmem>>, vector<1x1x16x16xf32>
      %42 = vector.shape_cast %41 : vector<1x1x16x16xf32> to vector<16x16xf32>
      %43 = vector.shape_cast %29 : vector<16x16xf32> to vector<1x1x16x16xf32>
      tpu.vector_store %arg5[%40, %c0_20, %c3, %c3_21], %43 {strides = array<i32>} : memref<1x2x22x22xf32, #tpu.memory_space<vmem>>, vector<1x1x16x16xf32>,
      %44 = arith.index_cast %4 : i32 to index
      %c1 = arith.constant 1 : index
      %c3_22 = arith.constant 3 : index
      %c3_23 = arith.constant 3 : index
      %45 = vector.load %arg5[%44, %c1, %c3_22, %c3_23] : memref<1x2x22x22xf32, #tpu.memory_space<vmem>>, vector<1x1x16x16xf32>
      %46 = vector.shape_cast %45 : vector<1x1x16x16xf32> to vector<16x16xf32>
      %47 = vector.shape_cast %30 : vector<16x16xf32> to vector<1x1x16x16xf32>
      tpu.vector_store %arg5[%44, %c1, %c3_22, %c3_23], %47 {strides = array<i32>} : memref<1x2x22x22xf32, #tpu.memory_space<vmem>>, vector<1x1x16x16xf32>,
    } else {
    }
    %c0_i32_15 = arith.constant 0 : i32
    %34 = arith.cmpi sgt, %arg1, %c0_i32_15 : i32
    %35 = arith.extui %34 : i1 to i32
    %c0_i32_16 = arith.constant 0 : i32
    %36 = arith.cmpi ne, %35, %c0_i32_16 : i32
    scf.if %36 {
      %40 = arith.index_cast %4 : i32 to index
      %c0_20 = arith.constant 0 : index
      %c3 = arith.constant 3 : index
      %c3_21 = arith.constant 3 : index
      %41 = vector.load %arg5[%40, %c0_20, %c3, %c3_21] : memref<1x2x22x22xf32, #tpu.memory_space<vmem>>, vector<1x1x16x16xf32>
      %42 = vector.shape_cast %41 : vector<1x1x16x16xf32> to vector<16x16xf32>
      %43 = arith.addf %42, %29 : vector<16x16xf32>
      %44 = arith.index_cast %4 : i32 to index
      %c0_22 = arith.constant 0 : index
      %c3_23 = arith.constant 3 : index
      %c3_24 = arith.constant 3 : index
      %45 = vector.load %arg5[%44, %c0_22, %c3_23, %c3_24] : memref<1x2x22x22xf32, #tpu.memory_space<vmem>>, vector<1x1x16x16xf32>
      %46 = vector.shape_cast %45 : vector<1x1x16x16xf32> to vector<16x16xf32>
      %47 = vector.shape_cast %43 : vector<16x16xf32> to vector<1x1x16x16xf32>
      tpu.vector_store %arg5[%44, %c0_22, %c3_23, %c3_24], %47 {strides = array<i32>} : memref<1x2x22x22xf32, #tpu.memory_space<vmem>>, vector<1x1x16x16xf32>,
      %48 = arith.index_cast %4 : i32 to index
      %c1 = arith.constant 1 : index
      %c3_25 = arith.constant 3 : index
      %c3_26 = arith.constant 3 : index
      %49 = vector.load %arg5[%48, %c1, %c3_25, %c3_26] : memref<1x2x22x22xf32, #tpu.memory_space<vmem>>, vector<1x1x16x16xf32>
      %50 = vector.shape_cast %49 : vector<1x1x16x16xf32> to vector<16x16xf32>
      %51 = arith.maximumf %50, %30 : vector<16x16xf32>
      %52 = arith.index_cast %4 : i32 to index
      %c1_27 = arith.constant 1 : index
      %c3_28 = arith.constant 3 : index
      %c3_29 = arith.constant 3 : index
      %53 = vector.load %arg5[%52, %c1_27, %c3_28, %c3_29] : memref<1x2x22x22xf32, #tpu.memory_space<vmem>>, vector<1x1x16x16xf32>
      %54 = vector.shape_cast %53 : vector<1x1x16x16xf32> to vector<16x16xf32>
      %55 = vector.shape_cast %51 : vector<16x16xf32> to vector<1x1x16x16xf32>
      tpu.vector_store %arg5[%52, %c1_27, %c3_28, %c3_29], %55 {strides = array<i32>} : memref<1x2x22x22xf32, #tpu.memory_space<vmem>>, vector<1x1x16x16xf32>,
    } else {
    }
    %c1_i32_17 = arith.constant 1 : i32
    %c0_i32_18 = arith.constant 0 : i32
    %37 = arith.cmpi eq, %arg1, %c0_i32_18 : i32
    %38 = arith.extui %37 : i1 to i32
    %c0_i32_19 = arith.constant 0 : i32
    %39 = arith.cmpi ne, %38, %c0_i32_19 : i32
    scf.if %39 {
      %c0_i32_20 = arith.constant 0 : i32
      %c1_i32_21 = arith.constant 1 : i32
      %40 = arith.muli %c0_i32_20, %c1_i32_21 : i32
      %c0_i32_22 = arith.constant 0 : i32
      %41 = arith.addi %c0_i32_22, %40 : i32
      %cst_23 = arith.constant 0.000000e+00 : f32
      %42 = vector.broadcast %cst_23 : f32 to vector<16x16xf32>
      %43 = arith.index_cast %41 : i32 to index
      %c0_24 = arith.constant 0 : index
      %c0_25 = arith.constant 0 : index
      %c0_26 = arith.constant 0 : index
      %44 = vector.load %arg5[%43, %c0_24, %c0_25, %c0_26] : memref<1x2x22x22xf32, #tpu.memory_space<vmem>>, vector<1x1x16x22xf32>
      %45 = vector.shape_cast %44 : vector<1x1x16x22xf32> to vector<16x22xf32>
      %c0_27 = arith.constant 0 : index
      %c0_28 = arith.constant 0 : index
      %c0_29 = arith.constant 0 : index
      %c0_30 = arith.constant 0 : index
      %46 = vector.load %arg2[%c0_27, %c0_28, %c0_29, %c0_30] : memref<2x7x22x16xf32, #tpu.memory_space<vmem>>, vector<1x1x22x16xf32>
      %47 = vector.shape_cast %46 : vector<1x1x22x16xf32> to vector<22x16xf32>
      %cst_31 = arith.constant dense<0.000000e+00> : vector<16x16xf32>
      %48 = tpu.matmul %45, %47, %cst_31 {dimension_numbers = #tpu.dot_dimension_numbers<[1], [0], [0], [1], [0, 0, 1, 1], [], []>} : vector<16x22xf32>, vector<22x16xf32>, vector<16x16xf32> -> vector<16x16xf32>
      %49 = arith.addf %42, %48 : vector<16x16xf32>
      %50 = arith.index_cast %41 : i32 to index
      %c0_32 = arith.constant 0 : index
      %c1 = arith.constant 1 : index
      %c0_33 = arith.constant 0 : index
      %51 = vector.load %arg5[%50, %c0_32, %c1, %c0_33] : memref<1x2x22x22xf32, #tpu.memory_space<vmem>>, vector<1x1x16x22xf32>
      %52 = vector.shape_cast %51 : vector<1x1x16x22xf32> to vector<16x22xf32>
      %c0_34 = arith.constant 0 : index
      %c1_35 = arith.constant 1 : index
      %c0_36 = arith.constant 0 : index
      %c0_37 = arith.constant 0 : index
      %53 = vector.load %arg2[%c0_34, %c1_35, %c0_36, %c0_37] : memref<2x7x22x16xf32, #tpu.memory_space<vmem>>, vector<1x1x22x16xf32>
      %54 = vector.shape_cast %53 : vector<1x1x22x16xf32> to vector<22x16xf32>
      %cst_38 = arith.constant dense<0.000000e+00> : vector<16x16xf32>
      %55 = tpu.matmul %52, %54, %cst_38 {dimension_numbers = #tpu.dot_dimension_numbers<[1], [0], [0], [1], [0, 0, 1, 1], [], []>} : vector<16x22xf32>, vector<22x16xf32>, vector<16x16xf32> -> vector<16x16xf32>
      %56 = arith.addf %49, %55 : vector<16x16xf32>
      %57 = arith.index_cast %41 : i32 to index
      %c0_39 = arith.constant 0 : index
      %c2 = arith.constant 2 : index
      %c0_40 = arith.constant 0 : index
      %58 = vector.load %arg5[%57, %c0_39, %c2, %c0_40] : memref<1x2x22x22xf32, #tpu.memory_space<vmem>>, vector<1x1x16x22xf32>
      %59 = vector.shape_cast %58 : vector<1x1x16x22xf32> to vector<16x22xf32>
      %c0_41 = arith.constant 0 : index
      %c2_42 = arith.constant 2 : index
      %c0_43 = arith.constant 0 : index
      %c0_44 = arith.constant 0 : index
      %60 = vector.load %arg2[%c0_41, %c2_42, %c0_43, %c0_44] : memref<2x7x22x16xf32, #tpu.memory_space<vmem>>, vector<1x1x22x16xf32>
      %61 = vector.shape_cast %60 : vector<1x1x22x16xf32> to vector<22x16xf32>
      %cst_45 = arith.constant dense<0.000000e+00> : vector<16x16xf32>
      %62 = tpu.matmul %59, %61, %cst_45 {dimension_numbers = #tpu.dot_dimension_numbers<[1], [0], [0], [1], [0, 0, 1, 1], [], []>} : vector<16x22xf32>, vector<22x16xf32>, vector<16x16xf32> -> vector<16x16xf32>
      %63 = arith.addf %56, %62 : vector<16x16xf32>
      %64 = arith.index_cast %41 : i32 to index
      %c0_46 = arith.constant 0 : index
      %c3 = arith.constant 3 : index
      %c0_47 = arith.constant 0 : index
      %65 = vector.load %arg5[%64, %c0_46, %c3, %c0_47] : memref<1x2x22x22xf32, #tpu.memory_space<vmem>>, vector<1x1x16x22xf32>
      %66 = vector.shape_cast %65 : vector<1x1x16x22xf32> to vector<16x22xf32>
      %c0_48 = arith.constant 0 : index
      %c3_49 = arith.constant 3 : index
      %c0_50 = arith.constant 0 : index
      %c0_51 = arith.constant 0 : index
      %67 = vector.load %arg2[%c0_48, %c3_49, %c0_50, %c0_51] : memref<2x7x22x16xf32, #tpu.memory_space<vmem>>, vector<1x1x22x16xf32>
      %68 = vector.shape_cast %67 : vector<1x1x22x16xf32> to vector<22x16xf32>
      %cst_52 = arith.constant dense<0.000000e+00> : vector<16x16xf32>
      %69 = tpu.matmul %66, %68, %cst_52 {dimension_numbers = #tpu.dot_dimension_numbers<[1], [0], [0], [1], [0, 0, 1, 1], [], []>} : vector<16x22xf32>, vector<22x16xf32>, vector<16x16xf32> -> vector<16x16xf32>
      %70 = arith.addf %63, %69 : vector<16x16xf32>
      %71 = arith.index_cast %41 : i32 to index
      %c0_53 = arith.constant 0 : index
      %c4 = arith.constant 4 : index
      %c0_54 = arith.constant 0 : index
      %72 = vector.load %arg5[%71, %c0_53, %c4, %c0_54] : memref<1x2x22x22xf32, #tpu.memory_space<vmem>>, vector<1x1x16x22xf32>
      %73 = vector.shape_cast %72 : vector<1x1x16x22xf32> to vector<16x22xf32>
      %c0_55 = arith.constant 0 : index
      %c4_56 = arith.constant 4 : index
      %c0_57 = arith.constant 0 : index
      %c0_58 = arith.constant 0 : index
      %74 = vector.load %arg2[%c0_55, %c4_56, %c0_57, %c0_58] : memref<2x7x22x16xf32, #tpu.memory_space<vmem>>, vector<1x1x22x16xf32>
      %75 = vector.shape_cast %74 : vector<1x1x22x16xf32> to vector<22x16xf32>
      %cst_59 = arith.constant dense<0.000000e+00> : vector<16x16xf32>
      %76 = tpu.matmul %73, %75, %cst_59 {dimension_numbers = #tpu.dot_dimension_numbers<[1], [0], [0], [1], [0, 0, 1, 1], [], []>} : vector<16x22xf32>, vector<22x16xf32>, vector<16x16xf32> -> vector<16x16xf32>
      %77 = arith.addf %70, %76 : vector<16x16xf32>
      %78 = arith.index_cast %41 : i32 to index
      %c0_60 = arith.constant 0 : index
      %c5 = arith.constant 5 : index
      %c0_61 = arith.constant 0 : index
      %79 = vector.load %arg5[%78, %c0_60, %c5, %c0_61] : memref<1x2x22x22xf32, #tpu.memory_space<vmem>>, vector<1x1x16x22xf32>
      %80 = vector.shape_cast %79 : vector<1x1x16x22xf32> to vector<16x22xf32>
      %c0_62 = arith.constant 0 : index
      %c5_63 = arith.constant 5 : index
      %c0_64 = arith.constant 0 : index
      %c0_65 = arith.constant 0 : index
      %81 = vector.load %arg2[%c0_62, %c5_63, %c0_64, %c0_65] : memref<2x7x22x16xf32, #tpu.memory_space<vmem>>, vector<1x1x22x16xf32>
      %82 = vector.shape_cast %81 : vector<1x1x22x16xf32> to vector<22x16xf32>
      %cst_66 = arith.constant dense<0.000000e+00> : vector<16x16xf32>
      %83 = tpu.matmul %80, %82, %cst_66 {dimension_numbers = #tpu.dot_dimension_numbers<[1], [0], [0], [1], [0, 0, 1, 1], [], []>} : vector<16x22xf32>, vector<22x16xf32>, vector<16x16xf32> -> vector<16x16xf32>
      %84 = arith.addf %77, %83 : vector<16x16xf32>
      %85 = arith.index_cast %41 : i32 to index
      %c0_67 = arith.constant 0 : index
      %c6 = arith.constant 6 : index
      %c0_68 = arith.constant 0 : index
      %86 = vector.load %arg5[%85, %c0_67, %c6, %c0_68] : memref<1x2x22x22xf32, #tpu.memory_space<vmem>>, vector<1x1x16x22xf32>
      %87 = vector.shape_cast %86 : vector<1x1x16x22xf32> to vector<16x22xf32>
      %c0_69 = arith.constant 0 : index
      %c6_70 = arith.constant 6 : index
      %c0_71 = arith.constant 0 : index
      %c0_72 = arith.constant 0 : index
      %88 = vector.load %arg2[%c0_69, %c6_70, %c0_71, %c0_72] : memref<2x7x22x16xf32, #tpu.memory_space<vmem>>, vector<1x1x22x16xf32>
      %89 = vector.shape_cast %88 : vector<1x1x22x16xf32> to vector<22x16xf32>
      %cst_73 = arith.constant dense<0.000000e+00> : vector<16x16xf32>
      %90 = tpu.matmul %87, %89, %cst_73 {dimension_numbers = #tpu.dot_dimension_numbers<[1], [0], [0], [1], [0, 0, 1, 1], [], []>} : vector<16x22xf32>, vector<22x16xf32>, vector<16x16xf32> -> vector<16x16xf32>
      %91 = arith.addf %84, %90 : vector<16x16xf32>
      %92 = arith.index_cast %41 : i32 to index
      %c1_74 = arith.constant 1 : index
      %c0_75 = arith.constant 0 : index
      %c0_76 = arith.constant 0 : index
      %93 = vector.load %arg5[%92, %c1_74, %c0_75, %c0_76] : memref<1x2x22x22xf32, #tpu.memory_space<vmem>>, vector<1x1x16x22xf32>
      %94 = vector.shape_cast %93 : vector<1x1x16x22xf32> to vector<16x22xf32>
      %c1_77 = arith.constant 1 : index
      %c0_78 = arith.constant 0 : index
      %c0_79 = arith.constant 0 : index
      %c0_80 = arith.constant 0 : index
      %95 = vector.load %arg2[%c1_77, %c0_78, %c0_79, %c0_80] : memref<2x7x22x16xf32, #tpu.memory_space<vmem>>, vector<1x1x22x16xf32>
      %96 = vector.shape_cast %95 : vector<1x1x22x16xf32> to vector<22x16xf32>
      %cst_81 = arith.constant dense<0.000000e+00> : vector<16x16xf32>
      %97 = tpu.matmul %94, %96, %cst_81 {dimension_numbers = #tpu.dot_dimension_numbers<[1], [0], [0], [1], [0, 0, 1, 1], [], []>} : vector<16x22xf32>, vector<22x16xf32>, vector<16x16xf32> -> vector<16x16xf32>
      %98 = arith.addf %91, %97 : vector<16x16xf32>
      %99 = arith.index_cast %41 : i32 to index
      %c1_82 = arith.constant 1 : index
      %c1_83 = arith.constant 1 : index
      %c0_84 = arith.constant 0 : index
      %100 = vector.load %arg5[%99, %c1_82, %c1_83, %c0_84] : memref<1x2x22x22xf32, #tpu.memory_space<vmem>>, vector<1x1x16x22xf32>
      %101 = vector.shape_cast %100 : vector<1x1x16x22xf32> to vector<16x22xf32>
      %c1_85 = arith.constant 1 : index
      %c1_86 = arith.constant 1 : index
      %c0_87 = arith.constant 0 : index
      %c0_88 = arith.constant 0 : index
      %102 = vector.load %arg2[%c1_85, %c1_86, %c0_87, %c0_88] : memref<2x7x22x16xf32, #tpu.memory_space<vmem>>, vector<1x1x22x16xf32>
      %103 = vector.shape_cast %102 : vector<1x1x22x16xf32> to vector<22x16xf32>
      %cst_89 = arith.constant dense<0.000000e+00> : vector<16x16xf32>
      %104 = tpu.matmul %101, %103, %cst_89 {dimension_numbers = #tpu.dot_dimension_numbers<[1], [0], [0], [1], [0, 0, 1, 1], [], []>} : vector<16x22xf32>, vector<22x16xf32>, vector<16x16xf32> -> vector<16x16xf32>
      %105 = arith.addf %98, %104 : vector<16x16xf32>
      %106 = arith.index_cast %41 : i32 to index
      %c1_90 = arith.constant 1 : index
      %c2_91 = arith.constant 2 : index
      %c0_92 = arith.constant 0 : index
      %107 = vector.load %arg5[%106, %c1_90, %c2_91, %c0_92] : memref<1x2x22x22xf32, #tpu.memory_space<vmem>>, vector<1x1x16x22xf32>
      %108 = vector.shape_cast %107 : vector<1x1x16x22xf32> to vector<16x22xf32>
      %c1_93 = arith.constant 1 : index
      %c2_94 = arith.constant 2 : index
      %c0_95 = arith.constant 0 : index
      %c0_96 = arith.constant 0 : index
      %109 = vector.load %arg2[%c1_93, %c2_94, %c0_95, %c0_96] : memref<2x7x22x16xf32, #tpu.memory_space<vmem>>, vector<1x1x22x16xf32>
      %110 = vector.shape_cast %109 : vector<1x1x22x16xf32> to vector<22x16xf32>
      %cst_97 = arith.constant dense<0.000000e+00> : vector<16x16xf32>
      %111 = tpu.matmul %108, %110, %cst_97 {dimension_numbers = #tpu.dot_dimension_numbers<[1], [0], [0], [1], [0, 0, 1, 1], [], []>} : vector<16x22xf32>, vector<22x16xf32>, vector<16x16xf32> -> vector<16x16xf32>
      %112 = arith.addf %105, %111 : vector<16x16xf32>
      %113 = arith.index_cast %41 : i32 to index
      %c1_98 = arith.constant 1 : index
      %c3_99 = arith.constant 3 : index
      %c0_100 = arith.constant 0 : index
      %114 = vector.load %arg5[%113, %c1_98, %c3_99, %c0_100] : memref<1x2x22x22xf32, #tpu.memory_space<vmem>>, vector<1x1x16x22xf32>
      %115 = vector.shape_cast %114 : vector<1x1x16x22xf32> to vector<16x22xf32>
      %c1_101 = arith.constant 1 : index
      %c3_102 = arith.constant 3 : index
      %c0_103 = arith.constant 0 : index
      %c0_104 = arith.constant 0 : index
      %116 = vector.load %arg2[%c1_101, %c3_102, %c0_103, %c0_104] : memref<2x7x22x16xf32, #tpu.memory_space<vmem>>, vector<1x1x22x16xf32>
      %117 = vector.shape_cast %116 : vector<1x1x22x16xf32> to vector<22x16xf32>
      %cst_105 = arith.constant dense<0.000000e+00> : vector<16x16xf32>
      %118 = tpu.matmul %115, %117, %cst_105 {dimension_numbers = #tpu.dot_dimension_numbers<[1], [0], [0], [1], [0, 0, 1, 1], [], []>} : vector<16x22xf32>, vector<22x16xf32>, vector<16x16xf32> -> vector<16x16xf32>
      %119 = arith.addf %112, %118 : vector<16x16xf32>
      %120 = arith.index_cast %41 : i32 to index
      %c1_106 = arith.constant 1 : index
      %c4_107 = arith.constant 4 : index
      %c0_108 = arith.constant 0 : index
      %121 = vector.load %arg5[%120, %c1_106, %c4_107, %c0_108] : memref<1x2x22x22xf32, #tpu.memory_space<vmem>>, vector<1x1x16x22xf32>
      %122 = vector.shape_cast %121 : vector<1x1x16x22xf32> to vector<16x22xf32>
      %c1_109 = arith.constant 1 : index
      %c4_110 = arith.constant 4 : index
      %c0_111 = arith.constant 0 : index
      %c0_112 = arith.constant 0 : index
      %123 = vector.load %arg2[%c1_109, %c4_110, %c0_111, %c0_112] : memref<2x7x22x16xf32, #tpu.memory_space<vmem>>, vector<1x1x22x16xf32>
      %124 = vector.shape_cast %123 : vector<1x1x22x16xf32> to vector<22x16xf32>
      %cst_113 = arith.constant dense<0.000000e+00> : vector<16x16xf32>
      %125 = tpu.matmul %122, %124, %cst_113 {dimension_numbers = #tpu.dot_dimension_numbers<[1], [0], [0], [1], [0, 0, 1, 1], [], []>} : vector<16x22xf32>, vector<22x16xf32>, vector<16x16xf32> -> vector<16x16xf32>
      %126 = arith.addf %119, %125 : vector<16x16xf32>
      %127 = arith.index_cast %41 : i32 to index
      %c1_114 = arith.constant 1 : index
      %c5_115 = arith.constant 5 : index
      %c0_116 = arith.constant 0 : index
      %128 = vector.load %arg5[%127, %c1_114, %c5_115, %c0_116] : memref<1x2x22x22xf32, #tpu.memory_space<vmem>>, vector<1x1x16x22xf32>
      %129 = vector.shape_cast %128 : vector<1x1x16x22xf32> to vector<16x22xf32>
      %c1_117 = arith.constant 1 : index
      %c5_118 = arith.constant 5 : index
      %c0_119 = arith.constant 0 : index
      %c0_120 = arith.constant 0 : index
      %130 = vector.load %arg2[%c1_117, %c5_118, %c0_119, %c0_120] : memref<2x7x22x16xf32, #tpu.memory_space<vmem>>, vector<1x1x22x16xf32>
      %131 = vector.shape_cast %130 : vector<1x1x22x16xf32> to vector<22x16xf32>
      %cst_121 = arith.constant dense<0.000000e+00> : vector<16x16xf32>
      %132 = tpu.matmul %129, %131, %cst_121 {dimension_numbers = #tpu.dot_dimension_numbers<[1], [0], [0], [1], [0, 0, 1, 1], [], []>} : vector<16x22xf32>, vector<22x16xf32>, vector<16x16xf32> -> vector<16x16xf32>
      %133 = arith.addf %126, %132 : vector<16x16xf32>
      %134 = arith.index_cast %41 : i32 to index
      %c1_122 = arith.constant 1 : index
      %c6_123 = arith.constant 6 : index
      %c0_124 = arith.constant 0 : index
      %135 = vector.load %arg5[%134, %c1_122, %c6_123, %c0_124] : memref<1x2x22x22xf32, #tpu.memory_space<vmem>>, vector<1x1x16x22xf32>
      %136 = vector.shape_cast %135 : vector<1x1x16x22xf32> to vector<16x22xf32>
      %c1_125 = arith.constant 1 : index
      %c6_126 = arith.constant 6 : index
      %c0_127 = arith.constant 0 : index
      %c0_128 = arith.constant 0 : index
      %137 = vector.load %arg2[%c1_125, %c6_126, %c0_127, %c0_128] : memref<2x7x22x16xf32, #tpu.memory_space<vmem>>, vector<1x1x22x16xf32>
      %138 = vector.shape_cast %137 : vector<1x1x22x16xf32> to vector<22x16xf32>
      %cst_129 = arith.constant dense<0.000000e+00> : vector<16x16xf32>
      %139 = tpu.matmul %136, %138, %cst_129 {dimension_numbers = #tpu.dot_dimension_numbers<[1], [0], [0], [1], [0, 0, 1, 1], [], []>} : vector<16x22xf32>, vector<22x16xf32>, vector<16x16xf32> -> vector<16x16xf32>
      %140 = arith.addf %133, %139 : vector<16x16xf32>
      %141 = arith.negf %140 : vector<16x16xf32>
      %142 = math.exp %141 : vector<16x16xf32>
      %cst_130 = arith.constant 1.000000e+00 : f32
      %143 = vector.broadcast %cst_130 : f32 to vector<16x16xf32>
      %144 = arith.addf %143, %142 : vector<16x16xf32>
      %145 = arith.divf %143, %144 : vector<16x16xf32>
      %146 = arith.index_cast %41 : i32 to index
      %c0_131 = arith.constant 0 : index
      %c0_132 = arith.constant 0 : index
      %c0_133 = arith.constant 0 : index
      %147 = vector.load %arg4[%146, %c0_131, %c0_132, %c0_133] : memref<1x1x16x16xf32, #tpu.memory_space<vmem>>, vector<1x1x16x16xf32>
      %148 = vector.shape_cast %147 : vector<1x1x16x16xf32> to vector<16x16xf32>
      %149 = vector.shape_cast %145 : vector<16x16xf32> to vector<1x1x16x16xf32>
      tpu.vector_store %arg4[%146, %c0_131, %c0_132, %c0_133], %149 {strides = array<i32>} : memref<1x1x16x16xf32, #tpu.memory_space<vmem>>, vector<1x1x16x16xf32>,
      %c1_i32_134 = arith.constant 1 : i32
    } else {
    }
    return
  }
  func.func @transform_0(%arg0: i32, %arg1: i32) -> (i32, i32, i32, i32) {
    %c0_i32 = arith.constant 0 : i32
    %c0_i32_0 = arith.constant 0 : i32
    %c0_i32_1 = arith.constant 0 : i32
    %c0_i32_2 = arith.constant 0 : i32
    %c0_i32_3 = arith.constant 0 : i32
    return %c0_i32, %c0_i32_0, %c0_i32_1, %c0_i32_2 : i32, i32, i32, i32
  }
  func.func @transform_1(%arg0: i32, %arg1: i32) -> (i32, i32, i32, i32) {
    %c0_i32 = arith.constant 0 : i32
    %c0_i32_0 = arith.constant 0 : i32
    %c0_i32_1 = arith.constant 0 : i32
    return %arg0, %arg1, %c0_i32, %c0_i32_0 : i32, i32, i32, i32
  }
  func.func @transform_2(%arg0: i32, %arg1: i32) -> (i32, i32, i32, i32) {
    %c0_i32 = arith.constant 0 : i32
    %c0_i32_0 = arith.constant 0 : i32
    %c0_i32_1 = arith.constant 0 : i32
    %c0_i32_2 = arith.constant 0 : i32
    return %arg0, %c0_i32, %c0_i32_0, %c0_i32_1 : i32, i32, i32, i32
  }
}

</mosaic_0001>

<bundles_post_ra>
// kernel: tpu_custom_call.1
= control target key start
LH: loop header
LB: loop body
LE: loop exit
PB: predicated region body
PF: predicated region fallthrough
CT: control target
= control target key end

     0   :  { %7 = vsyncpa [#allocation4], 0  ;;  %s1523_s0 = inlined_call_operand.vmem [shape: f32[2,7,22,16], index: 0, kind: input, shape index: {}]   ;;  %s1524_s1 = inlined_call_operand.vmem [shape: f32[2,4,16,16], index: 1, kind: input, shape index: {}]   ;;  %s1525_s2 = inlined_call_operand.hbm [shape: f32[2,1,16,16], index: 2, kind: output, shape index: {}]  }
   0x1   :  { %9 = vsyncpa [#allocation4 + $0x1], 0  ;;  %s1242_s9 = smov 0   ;;  %s1244_s10 = smov 0  }
   0x2   :  { %s1246_s11 = smov 0   ;;  %s1248_s12 = smov 0  }
   0x3   :  { %s1250_s13 = smov 0   ;;  %s1252_s14 = smov 0  }
   0x4 LB: > { %s966_s15 = sadd.s32 4294967295, %s1221_s14   ;;  %s967_s16 = sadd.s32 4294967294, %s1221_s14   ;;  %s1221_s14 = sphi %s1252_s14, %s15_s14   ;;  %s1217_s13 = sphi %s1250_s13, %s1532_s13   ;;  %s1213_s12 = sphi %s1248_s12, %s1531_s12   ;;  %s1209_s11 = sphi %s1246_s11, %s1530_s11   ;;  %s1205_s10 = sphi %s1244_s10, %s1529_s10   ;;  %s1201_s9 = sphi %s1242_s9, %s1528_s9  }
   0x5   : > { %s27_s17 = sadd.s32 1, %s1217_s13  ;;  %s83_s18 = sadd.s32 1, %s1209_s11 }
   0x6   : > { %p29_p0 = scmp.ge.s32.totalorder %s27_s17, 2  ;;  %p93_p1 = scmp.ne.s32.totalorder %s1209_s11, %s1205_s10 }
   0x7   : > { %p94_p2 = scmp.eq.s32.totalorder %s966_s15, 1  ;;  %p99_p3 = scmp.ne.s32.totalorder %s1205_s10, %s1201_s9 }
   0x8   : > { %s1534_s17 = smov (%p29_p0, %s27_s17), 0  ;;  %p100_p5 = scmp.eq.s32.totalorder %s967_s16, 1 }
   0x9   : > { %p1282_p4 = por %p94_p2, %p93_p1  ;;  %s80_s20 = ssub.s32 %s1217_s13, %s1534_s17 }
   0xa   : > { %p970_p6 = scmp.ge.s32.totalorder %s1221_s14, 1  ;;  %p81_p7 = scmp.eq.s32.totalorder %s80_s20, 0 }
   0xb   : > { %p1289_p8 = por %p100_p5, %p99_p3  ;;  %p135_p9 = scmp.lt.s32.totalorder %s1221_s14, 3 }
   0xc   : > { %s1295_s22 = scalar_select %p81_p7, %s1209_s11, %s83_s18  }
   0xd   : > { %p136_p10 = pnand %p970_p6, %p135_p9 }
   0xe   : > { %p163_p11 = scmp.lt.s32.totalorder (!%p136_p10), %s1213_s12, 1  ;;  %s1224_s28 = smov (!%p136_p10), 3  }
   0xf   : > { %139 = sbr.rel (%p136_p10) target bundleno = 382 (0x17e), region = 28  ;;  %s1069_s25 = sshll.u32 (!%p136_p10), %s1213_s12, 4 }
  0x10   : > { %s1163_s8 = scalar_lea.hbm (!%p136_p10), %s1525_s2, 32 }
  0x14   : > { %vm177_vm0 = vcmask 179200   ;;  %v1223_v0 = vmov 0.0   ;;  %s164_s23 = scalar_select %p163_p11, %s1213_s12, 1  ;;  %v982_v21 = vld [vmem:[%s1523_s0 + $0x28] sm:$0x3f]  ;;  %vm290_vm1 = vcmask 1045504  }
  0x15   : > { %178 = vst.msk [vmem:[#allocation2] sm:$0xff] %vm177_vm0, %v1223_v0  ;;  %v276_v22 = vld [vmem:[%s1523_s0 + $0x10] sm:$0x3f]  ;;  %v981_v23 = vld [vmem:[%s1523_s0 + $0x20] sm:$0xff]  ;;  %983 = vmatpush.msk.msra.mxu0 %vm290_vm1, %v982_v21  ;;  %v275_v24 = vld [vmem:[%s1523_s0 + $0x8] sm:$0xff]  ;;  %vm180_vm2 = vcmask 177152   ;;  %1070 = vmatpush.msk.msra.mxu2 %vm290_vm1, %v982_v21 }
  0x16   : > { %179 = vst.msk [vmem:[#allocation2 + $0x8] sm:$0xff] %vm177_vm0, %v1223_v0  ;;  %s1068_s24 = sshll.u32 %s164_s23, 6  ;;  %986 = vmatpush.msk.msra.mxu1 %vm290_vm1, %v276_v22  ;;  %v980_v25 = vld [vmem:[%s1523_s0 + $0x18] sm:$0xff]  ;;  %v274_v26 = vld [vmem:[%s1523_s0] sm:$0xff]  ;;  %1073 = vmatpush.msk.msra.mxu3 %vm290_vm1, %v276_v22  ;;  %v1003_v27 = vld [vmem:[%s1523_s0 + $0x70] sm:$0x3f] }
  0x17   : > { %182 = vst.msk [vmem:[#allocation2 + $0x18] sm:$0xff] %vm177_vm0, %v1223_v0  ;;  %s171_s27 = scalar_lea.vmem %s1524_s1, %s1068_s24  ;;  %308 = vmatpush.msra.mxu0 %v981_v23  ;;  %1071 = vmatpush.msra.mxu2 %v981_v23  ;;  %v1009_v28 = vld [vmem:[%s1523_s0 + $0x88] sm:$0x3f]  ;;  %v1008_v30 = vld [vmem:[%s1523_s0 + $0x80] sm:$0xff]  ;;  %v1007_v32 = vld [vmem:[%s1523_s0 + $0x78] sm:$0xff]  ;;  %vm221_vm3 = vcmask 154648  }
  0x18   : > { %183 = vst.msk [vmem:[#allocation2 + $0x20] sm:$0xff] %vm177_vm0, %v1223_v0  ;;  %v185_v1 = vld [vmem:[%s171_s27] sm:$0xff]  ;;  %v974_v2 = vld [vmem:[%s171_s27 + $0x10] sm:$0xff]  ;;  %v186_v5 = vld [vmem:[%s171_s27 + $0x8] sm:$0xff]  ;;  %340 = vmatpush.msra.mxu1 %v275_v24  ;;  %1074 = vmatpush.msra.mxu3 %v275_v24  ;;  %s159_s23 = sand.u32 1, %s1205_s10   ;;  %vm868_vm7 = vcmask 130048  }
  0x19   : > { %v976_v3 = vld [vmem:[%s171_s27 + $0x20] sm:$0xff]  ;;  %v192_v4 = vadd.f32 %v974_v2, %v185_v1  ;;  %v975_v6 = vld [vmem:[%s171_s27 + $0x18] sm:$0xff]  ;;  %v194_v7 = vmax.f32 %v185_v1, %v974_v2  ;;  %v978_v8 = vld [vmem:[%s171_s27 + $0x30] sm:$0xff]  ;;  %181 = vst.msk [vmem:[#allocation2 + $0x10] sm:$0x3f] %vm180_vm2, %v1223_v0  ;;  %309 = vmatpush.msra.mxu0 %v980_v25  ;;  %1072 = vmatpush.msra.mxu2 %v980_v25  ;;  %s971_s24 = sshll.u32 %s159_s23, 4 }
  0x1a   : > { %v193_v10 = vadd.f32 %v975_v6, %v186_v5  ;;  %v195_v12 = vmax.f32 %v186_v5, %v975_v6  ;;  %v977_v13 = vld [vmem:[%s171_s27 + $0x28] sm:$0xff]  ;;  %v979_v18 = vld [vmem:[%s171_s27 + $0x38] sm:$0xff]  ;;  %184 = vst.msk [vmem:[#allocation2 + $0x28] sm:$0x3f] %vm180_vm2, %v1223_v0  ;;  %341 = vmatpush.msra.mxu1 %v274_v26  ;;  %1075 = vmatpush.msra.mxu3 %v274_v26  ;;  %v1001_v31 = vld [vmem:[%s1523_s0 + $0x60] sm:$0xff]  ;;  %s161_s29 = scalar_lea.vmem [#allocation3], %s971_s24 }
  0x1b   : > { %v199_v9 = vadd.f32 %v976_v3, %v192_v4  ;;  %v201_v11 = vmax.f32 %v194_v7, %v976_v3  ;;  %v1002_v29 = vld [vmem:[%s1523_s0 + $0x68] sm:$0xff]  ;;  %1004 = vmatpush.msk.msrb.mxu0 %vm290_vm1, %v1003_v27  ;;  %v991_v33 = vld [vmem:[%s1523_s0 + $0x40] sm:$0x3f]  ;;  %v997_v34 = vld [vmem:[%s1523_s0 + $0x58] sm:$0x3f]  ;;  %s884_s12 = sshll.u32 %s161_s29, 4  ;;  %s885_s12 = int_to_ptr.vmem [resolvable:$true] %s884_s12 }
  0x1c   : > { %v200_v16 = vadd.f32 %v977_v13, %v193_v10  ;;  %v202_v17 = vmax.f32 %v195_v12, %v977_v13  ;;  %1010 = vmatpush.msk.msrb.mxu1 %vm290_vm1, %v1009_v28  ;;  %992 = vmatpush.msk.msrb.mxu2 %vm290_vm1, %v991_v33  ;;  %v990_v35 = vld [vmem:[%s1523_s0 + $0x38] sm:$0xff]  ;;  %v996_v36 = vld [vmem:[%s1523_s0 + $0x50] sm:$0xff]  ;;  %v995_v38 = vld [vmem:[%s1523_s0 + $0x48] sm:$0xff]  ;;  %s872_s3 = scalar_lea.sflag [#allocation4], %s159_s23 }
  0x1d   : > { %v206_v14 = vadd.f32 %v978_v8, %v199_v9  ;;  %v208_v15 = vmax.f32 %v201_v11, %v978_v8  ;;  %458 = vmatpush.msrb.mxu0 %v1002_v29  ;;  %998 = vmatpush.msk.msrb.mxu3 %vm290_vm1, %v997_v34  ;;  %v989_v37 = vld [vmem:[%s1523_s0 + $0x30] sm:$0xff]  ;;  %v1033_v42 = vld [vmem:[%s1523_s0 + $0xe8] sm:$0x3f]  ;;  %v1032_v48 = vld [vmem:[%s1523_s0 + $0xe0] sm:$0xff] }
  0x1e   : > { %v207_v19 = vadd.f32 %v979_v18, %v200_v16  ;;  %v209_v20 = vmax.f32 %v202_v17, %v979_v18  ;;  %498 = vmatpush.msrb.mxu1 %v1008_v30  ;;  %378 = vmatpush.msrb.mxu2 %v990_v35  ;;  %v1027_v41 = vld [vmem:[%s1523_s0 + $0xd0] sm:$0x3f]  ;;  %v1026_v47 = vld [vmem:[%s1523_s0 + $0xc8] sm:$0xff]  ;;  %v1025_v49 = vld [vmem:[%s1523_s0 + $0xc0] sm:$0xff] }
  0x1f   : > { %215 = vrot.lane.b32.xlu0 %v206_v14, %s1224_s28  ;;  %226 = vrot.lane.b32.xlu1 %v208_v15, %s1224_s28  ;;  %v1031_v50 = vld [vmem:[%s1523_s0 + $0xd8] sm:$0xff]  ;;  %v1015_v51 = vld [vmem:[%s1523_s0 + $0xa0] sm:$0x3f] }
  0x20   : > { %459 = vmatpush.msrb.mxu0 %v1001_v31  ;;  %499 = vmatpush.msrb.mxu1 %v1007_v32  ;;  %v1021_v52 = vld [vmem:[%s1523_s0 + $0xb8] sm:$0x3f]  ;;  %v1051_v57 = vld [vmem:[%s1523_s0 + $0x130] sm:$0x3f]  ;;  %v1057_v58 = vld [vmem:[%s1523_s0 + $0x148] sm:$0x3f] }
  0x21   : > { %418 = vmatpush.msrb.mxu3 %v996_v36  ;;  %379 = vmatpush.msrb.mxu2 %v989_v37  ;;  %v1014_v59 = vld [vmem:[%s1523_s0 + $0x98] sm:$0xff]  ;;  %v1020_v60 = vld [vmem:[%s1523_s0 + $0xb0] sm:$0xff]  ;;  %v1050_v61 = vld [vmem:[%s1523_s0 + $0x128] sm:$0xff] }
  0x22   : > { %v1056_v62 = vld [vmem:[%s1523_s0 + $0x140] sm:$0xff]  ;;  %v1013_v63 = vld [vmem:[%s1523_s0 + $0x90] sm:$0xff]  ;;  %v1019_v0 = vld [vmem:[%s1523_s0 + $0xa8] sm:$0xff] }
  0x23   : > { %419 = vmatpush.msrb.mxu3 %v995_v38  ;;  %v1049_v1 = vld [vmem:[%s1523_s0 + $0x120] sm:$0xff]  ;;  %v1055_v2 = vld [vmem:[%s1523_s0 + $0x138] sm:$0xff]  ;;  %v1044_v10 = vld [vmem:[%s1523_s0 + $0x110] sm:$0xff] }
  0x24   : > { %v1039_v5 = vld [vmem:[%s1523_s0 + $0x100] sm:$0x3f]  ;;  %v1045_v6 = vld [vmem:[%s1523_s0 + $0x118] sm:$0x3f]  ;;  %v1037_v11 = vld [vmem:[%s1523_s0 + $0xf0] sm:$0xff] }
  0x25   : > { %v1038_v9 = vld [vmem:[%s1523_s0 + $0xf8] sm:$0xff]  ;;  %v1043_v12 = vld [vmem:[%s1523_s0 + $0x108] sm:$0xff] }
  0x27   : > { %217 = vrot.lane.b32.xlu0 %v207_v19, %s1224_s28  ;;  %228 = vrot.lane.b32.xlu1 %v209_v20, %s1224_s28  ;;  %s883_s28 = scalar_lea.hbm %s1525_s2, %s1069_s25 }
  0x28   : > { %s886_s30 = sshll.u32 %s883_s28, 4  ;;  %s887_s30 = int_to_ptr.hbm [resolvable:$true] %s886_s30 }
  0x29   : > { %s1157_s4 = sshra.s32 %s887_s30, 4  ;;  %s1158_s4 = int_to_ptr.hbm [resolvable:$true] %s1157_s4 }
  0x2a   : > { %s1159_s5 = scalar_lea.hbm %s1158_s4, 16  ;;  %p1164_p1 = scmp.lt.s32.totalorder %s1158_s4, %s1525_s2 }
  0x2b   : > { %p1160_p12 = scmp.ne.s32.totalorder %s1158_s4, %s1159_s5  ;;  %p1165_p2 = scmp.lt.s32.totalorder %s1163_s8, %s1159_s5 }
  0x2d   : > { %p1161_p13 = pnand %p1160_p12, %p1282_p4  ;;  %p1166_p3 = por %p1165_p2, %p1164_p1 }
  0x2f   : > { %p1162_p0 = pneg %p1161_p13 }
  0x31   : > { %p1167_p5 = pnand %p1166_p3, %p1162_p0 }
  0x91   : > { %v216_v39 = vpop.permute.xlu0 %215  ;;  %v227_v40 = vpop.permute.xlu1 %226 }
  0x92   : > { %222 = vst.msk [vmem:[#allocation2 + $0x3] sm:$0xff] %vm221_vm3, %v216_v39 }
  0x93   : > { %233 = vst.msk [vmem:[#allocation2 + $0x1b] sm:$0xff] %vm221_vm3, %v227_v40 }
  0x99   : > { %v218_v43 = vpop.permute.xlu0 %217  ;;  %v277_v44 = vld [vmem:[#allocation2 + $0x1] sm:$0xff]  ;;  %v229_v46 = vpop.permute.xlu1 %228 }
  0x9a   : > { %v272_v45 = vld [vmem:[#allocation2] sm:$0xff]  ;;  %223 = vst.msk [vmem:[#allocation2 + $0xb] sm:$0xff] %vm221_vm3, %v218_v43  ;;  %984 = vmatmul.msk.f32.vlgmr.msra.gmra.mxu0 %vm177_vm0, %v277_v44  ;;  %v550_v17 = vld [vmem:[#allocation2 + $0x18] sm:$0xff] }
  0x9b   : > { %987 = vmatmul.msk.f32.vlgmr.msra.gmra.mxu1 %vm177_vm0, %v272_v45  ;;  %1028 = vmatpush.msk.msra.mxu0 %vm290_vm1, %v1027_v41  ;;  %234 = vst.msk [vmem:[#allocation2 + $0x23] sm:$0xff] %vm221_vm3, %v229_v46  ;;  %v349_v3 = vld [vmem:[#allocation2 + $0x2] sm:$0xff]  ;;  %v590_v13 = vld [vmem:[#allocation2 + $0x19] sm:$0xff] }
  0x9c   : > { %1034 = vmatpush.msk.msra.mxu1 %vm290_vm1, %v1033_v42  ;;  %v389_v4 = vld [vmem:[#allocation2 + $0x3] sm:$0xff]  ;;  %v630_v14 = vld [vmem:[#allocation2 + $0x1a] sm:$0xff] }
  0x9d   : > { %619 = vmatpush.msra.mxu0 %v1026_v47  ;;  %v670_v25 = vld [vmem:[#allocation2 + $0x1b] sm:$0xff] }
  0x9e   : > { %659 = vmatpush.msra.mxu1 %v1032_v48 }
  0x9f   : > { %620 = vmatpush.msra.mxu0 %v1025_v49 }
  0xa0   : > { %660 = vmatpush.msra.mxu1 %v1031_v50 }
  0xa1   : > { %v278_v53 = vld [vmem:[#allocation2 + $0x9] sm:$0xff] }
  0xa2   : > { %v273_v54 = vld [vmem:[#allocation2 + $0x8] sm:$0xff]  ;;  %985 = vmatmul.msk.f32.vlgmr.msra.gmra.mxu2 %vm177_vm0, %v278_v53  ;;  %v551_v22 = vld [vmem:[#allocation2 + $0x20] sm:$0xff] }
  0xa3   : > { %v429_v55 = vld [vmem:[#allocation2 + $0x4] sm:$0xff]  ;;  %988 = vmatmul.msk.f32.vlgmr.msra.gmra.mxu3 %vm177_vm0, %v273_v54  ;;  %1016 = vmatpush.msk.msra.mxu2 %vm290_vm1, %v1015_v51  ;;  %v430_v7 = vld [vmem:[#allocation2 + $0xc] sm:$0xff]  ;;  %v710_v26 = vld [vmem:[#allocation2 + $0x1c] sm:$0xff] }
  0xa4   : > { %v469_v56 = vld [vmem:[#allocation2 + $0x5] sm:$0xff]  ;;  %1005 = vmatmul.msk.f32.vlgmr.msrb.gmra.mxu0 %vm177_vm0, %v429_v55  ;;  %1022 = vmatpush.msk.msra.mxu3 %vm290_vm1, %v1021_v52  ;;  %v470_v8 = vld [vmem:[#allocation2 + $0xd] sm:$0xff]  ;;  %v750_v23 = vld [vmem:[#allocation2 + $0x1d] sm:$0xff] }
  0xa5   : > { %1011 = vmatmul.msk.f32.vlgmr.msrb.gmra.mxu1 %vm177_vm0, %v469_v56  ;;  %1052 = vmatpush.msk.msrb.mxu0 %vm290_vm1, %v1051_v57  ;;  %v350_v15 = vld [vmem:[#allocation2 + $0xa] sm:$0xff]  ;;  %v591_v18 = vld [vmem:[#allocation2 + $0x21] sm:$0xff] }
  0xa6   : > { %1058 = vmatpush.msk.msrb.mxu1 %vm290_vm1, %v1057_v58  ;;  %538 = vmatpush.msra.mxu2 %v1014_v59  ;;  %v390_v16 = vld [vmem:[#allocation2 + $0xb] sm:$0xff]  ;;  %v631_v19 = vld [vmem:[#allocation2 + $0x22] sm:$0xff] }
  0xa7   : > { %579 = vmatpush.msra.mxu3 %v1020_v60  ;;  %779 = vmatpush.msrb.mxu0 %v1050_v61  ;;  %v509_v20 = vld [vmem:[#allocation2 + $0x6] sm:$0xff]  ;;  %v510_v21 = vld [vmem:[#allocation2 + $0xe] sm:$0xff]  ;;  %v790_v24 = vld [vmem:[#allocation2 + $0x1e] sm:$0xff] }
  0xa8   : > { %819 = vmatpush.msrb.mxu1 %v1056_v62  ;;  %539 = vmatpush.msra.mxu2 %v1013_v63  ;;  %v751_v27 = vld [vmem:[#allocation2 + $0x25] sm:$0xff] }
  0xa9   : > { %580 = vmatpush.msra.mxu3 %v1019_v0  ;;  %780 = vmatpush.msrb.mxu0 %v1049_v1  ;;  %v791_v28 = vld [vmem:[#allocation2 + $0x26] sm:$0xff] }
  0xaa   : > { %820 = vmatpush.msrb.mxu1 %v1055_v2  ;;  %993 = vmatmul.msk.f32.vlgmr.msrb.gmra.mxu2 %vm177_vm0, %v349_v3  ;;  %v671_v29 = vld [vmem:[#allocation2 + $0x23] sm:$0xff] }
  0xab   : > { %999 = vmatmul.msk.f32.vlgmr.msrb.gmra.mxu3 %vm177_vm0, %v389_v4  ;;  %1040 = vmatpush.msk.msrb.mxu2 %vm290_vm1, %v1039_v5  ;;  %v711_v30 = vld [vmem:[#allocation2 + $0x24] sm:$0xff] }
  0xac   : > { %1006 = vmatmul.msk.f32.gmra.mxu0 %vm177_vm0, %v430_v7  ;;  %1046 = vmatpush.msk.msrb.mxu3 %vm290_vm1, %v1045_v6 }
  0xad   : > { %1012 = vmatmul.msk.f32.gmra.mxu1 %vm177_vm0, %v470_v8  ;;  %699 = vmatpush.msrb.mxu2 %v1038_v9 }
  0xae   : > { %739 = vmatpush.msrb.mxu3 %v1044_v10 }
  0xaf   : > { %700 = vmatpush.msrb.mxu2 %v1037_v11 }
  0xb0   : > { %740 = vmatpush.msrb.mxu3 %v1043_v12 }
  0xb2   : > { %994 = vmatmul.msk.f32.gmra.mxu2 %vm177_vm0, %v350_v15 }
  0xb3   : > { %1000 = vmatmul.msk.f32.gmra.mxu3 %vm177_vm0, %v390_v16 }
  0xb4   : > { %1029 = vmatmul.msk.f32.vlgmr.msra.gmra.mxu0 %vm177_vm0, %v590_v13 }
  0xb5   : > { %1035 = vmatmul.msk.f32.vlgmr.msra.gmra.mxu1 %vm177_vm0, %v630_v14 }
  0xba   : > { %1017 = vmatmul.msk.f32.vlgmr.msra.gmra.mxu2 %vm177_vm0, %v509_v20 }
  0xbb   : > { %1023 = vmatmul.msk.f32.vlgmr.msra.gmra.mxu3 %vm177_vm0, %v550_v17 }
  0xbc   : > { %1030 = vmatmul.msk.f32.gmra.mxu0 %vm177_vm0, %v591_v18 }
  0xbd   : > { %1036 = vmatmul.msk.f32.gmra.mxu1 %vm177_vm0, %v631_v19 }
  0xc2   : > { %1018 = vmatmul.msk.f32.gmra.mxu2 %vm177_vm0, %v510_v21 }
  0xc3   : > { %1024 = vmatmul.msk.f32.gmra.mxu3 %vm177_vm0, %v551_v22 }
  0xc4   : > { %1053 = vmatmul.msk.f32.vlgmr.msrb.gmra.mxu0 %vm177_vm0, %v750_v23 }
  0xc5   : > { %1059 = vmatmul.msk.f32.vlgmr.msrb.gmra.mxu1 %vm177_vm0, %v790_v24 }
  0xca   : > { %1041 = vmatmul.msk.f32.vlgmr.msrb.gmra.mxu2 %vm177_vm0, %v670_v25 }
  0xcb   : > { %1047 = vmatmul.msk.f32.vlgmr.msrb.gmra.mxu3 %vm177_vm0, %v710_v26 }
  0xcc   : > { %1054 = vmatmul.msk.f32.gmra.mxu0 %vm177_vm0, %v751_v27 }
  0xcd   : > { %1060 = vmatmul.msk.f32.gmra.mxu1 %vm177_vm0, %v791_v28 }
  0xd2   : > { %1042 = vmatmul.msk.f32.gmra.mxu2 %vm177_vm0, %v671_v29 }
  0xd3   : > { %1048 = vmatmul.msk.f32.gmra.mxu3 %vm177_vm0, %v711_v30 }
 0x117   : > { %v311_v31 = vpop.f32.mrf.mxu0 }
 0x118   : > { %v343_v32 = vpop.f32.mrf.mxu1 }
 0x119   : > { %v344_v39 = vadd.f32 %v343_v32, %v311_v31 }
 0x121   : > { %v461_v35 = vpop.f32.mrf.mxu0 }
 0x122   : > { %v501_v36 = vpop.f32.mrf.mxu1 }
 0x125   : > { %v314_v33 = vpop.f32.mrf.mxu2 }
 0x126   : > { %v346_v34 = vpop.f32.mrf.mxu3 }
 0x127   : > { %v347_v46 = vadd.f32 %v346_v34, %v314_v33 }
 0x129   : > { %v464_v40 = vpop.f32.mrf.mxu0 }
 0x12a   : > { %v504_v41 = vpop.f32.mrf.mxu1 }
 0x12d   : > { %v381_v37 = vpop.f32.mrf.mxu2 }
 0x12e   : > { %v421_v38 = vpop.f32.mrf.mxu3  ;;  %v387_v42 = vadd.f32 %v381_v37, %v344_v39 }
 0x130   : > { %v427_v45 = vadd.f32 %v421_v38, %v387_v42 }
 0x131   : > { %v622_v48 = vpop.f32.mrf.mxu0 }
 0x132   : > { %v467_v47 = vadd.f32 %v461_v35, %v427_v45  ;;  %v662_v50 = vpop.f32.mrf.mxu1 }
 0x134   : > { %v507_v54 = vadd.f32 %v501_v36, %v467_v47 }
 0x135   : > { %v384_v43 = vpop.f32.mrf.mxu2 }
 0x136   : > { %v424_v44 = vpop.f32.mrf.mxu3  ;;  %v388_v49 = vadd.f32 %v384_v43, %v347_v46 }
 0x138   : > { %v428_v53 = vadd.f32 %v424_v44, %v388_v49 }
 0x139   : > { %v625_v57 = vpop.f32.mrf.mxu0 }
 0x13a   : > { %v468_v56 = vadd.f32 %v464_v40, %v428_v53  ;;  %v665_v62 = vpop.f32.mrf.mxu1 }
 0x13c   : > { %v508_v61 = vadd.f32 %v504_v41, %v468_v56 }
 0x13d   : > { %v541_v51 = vpop.f32.mrf.mxu2 }
 0x13e   : > { %v582_v52 = vpop.f32.mrf.mxu3  ;;  %v547_v55 = vadd.f32 %v541_v51, %v507_v54 }
 0x140   : > { %v588_v58 = vadd.f32 %v582_v52, %v547_v55 }
 0x141   : > { %v782_v6 = vpop.f32.mrf.mxu0 }
 0x142   : > { %v628_v63 = vadd.f32 %v622_v48, %v588_v58  ;;  %v822_v9 = vpop.f32.mrf.mxu1 }
 0x144   : > { %v668_v2 = vadd.f32 %v662_v50, %v628_v63 }
 0x145   : > { %v544_v59 = vpop.f32.mrf.mxu2 }
 0x146   : > { %v585_v60 = vpop.f32.mrf.mxu3  ;;  %v548_v0 = vadd.f32 %v544_v59, %v508_v61 }
 0x148   : > { %v589_v1 = vadd.f32 %v585_v60, %v548_v0 }
 0x149   : > { %v785_v18 = vpop.f32.mrf.mxu0 }
 0x14a   : > { %v629_v7 = vadd.f32 %v625_v57, %v589_v1  ;;  %v825_v20 = vpop.f32.mrf.mxu1 }
 0x14c   : > { %v669_v12 = vadd.f32 %v665_v62, %v629_v7 }
 0x14d   : > { %v702_v3 = vpop.f32.mrf.mxu2 }
 0x14e   : > { %v742_v4 = vpop.f32.mrf.mxu3  ;;  %v708_v5 = vadd.f32 %v702_v3, %v668_v2 }
 0x150   : > { %v748_v8 = vadd.f32 %v742_v4, %v708_v5 }
 0x152   : > { %v788_v10 = vadd.f32 %v782_v6, %v748_v8 }
 0x154   : > { %v828_v11 = vadd.f32 %v822_v9, %v788_v10 }
 0x155   : > { %v705_v13 = vpop.f32.mrf.mxu2 }
 0x156   : > { %v1061_v14 = vmul.f32 -1.442695, %v828_v11  ;;  %v709_v15 = vadd.f32 %v705_v13, %v669_v12  ;;  %v745_v16 = vpop.f32.mrf.mxu3 }
 0x158   : > { %1135 = vpow2.f32 %v1061_v14  ;;  %v749_v17 = vadd.f32 %v745_v16, %v709_v15 }
 0x15a   : > { %v789_v19 = vadd.f32 %v785_v18, %v749_v17 }
 0x15c   : > { %v829_v21 = vadd.f32 %v825_v20, %v789_v19 }
 0x15e   : > { %v1136_v22 = vpop.eup %1135  ;;  %v1062_v23 = vmul.f32 -1.442695, %v829_v21 }
 0x15f   : > { %v836_v24 = vadd.f32 1.0, %v1136_v22 }
 0x160   : > { %1137 = vpow2.f32 %v1062_v23 }
 0x161   : > { %1139 = vrcp.f32 %v836_v24  ;;  %v849_v30 = vand.u32 2147483648, %v836_v24  ;;  %v847_v32 = vand.u32 2147483647, %v836_v24  ;;  %vm843_vm5 = vweird.f32 %v836_v24 }
 0x163   : > { %v850_v35 = vor.u32 1.1754944e-38, %v849_v30  ;;  %vm848_vm8 = vcmp.eq.f32.partialorder %v847_v32, 8.507059e+37 }
 0x166   : > { %v1138_v25 = vpop.eup %1137 }
 0x167   : > { %v1140_v26 = vpop.eup %1139  ;;  %v837_v27 = vadd.f32 1.0, %v1138_v25 }
 0x168   : > { %v839_v28 = vmul.f32 %v1140_v26, %v836_v24  ;;  %vm844_vm4 = vweird.f32 %v1140_v26 }
 0x169   : > { %1141 = vrcp.f32 %v837_v27  ;;  %vm845_vm6 = vmor %vm843_vm5, %vm844_vm4  ;;  %v864_v40 = vand.u32 2147483648, %v837_v27  ;;  %v862_v42 = vand.u32 2147483647, %v837_v27  ;;  %vm858_vm10 = vweird.f32 %v837_v27 }
 0x16a   : > { %v840_v29 = vsub.f32 1.0, %v839_v28 }
 0x16b   : > { %v865_v44 = vor.u32 1.1754944e-38, %v864_v40  ;;  %vm863_vm12 = vcmp.eq.f32.partialorder %v862_v42, 8.507059e+37 }
 0x16c   : > { %v841_v31 = vmul.f32 %v1140_v26, %v840_v29 }
 0x16e   : > { %v842_v33 = vadd.f32 %v1140_v26, %v841_v31 }
 0x16f   : > { %v1142_v34 = vpop.eup %1141 }
 0x170   : > { %v854_v36 = vmul.f32 %v1142_v34, %v837_v27  ;;  %v846_v37 = vsel %vm845_vm6, %v1140_v26, %v842_v33  ;;  %vm859_vm9 = vweird.f32 %v1142_v34 }
 0x171   : > { %v851_v38 = vsel %vm848_vm8, %v850_v35, %v846_v37  ;;  %vm860_vm11 = vmor %vm858_vm10, %vm859_vm9 }
 0x172   : > { %v855_v39 = vsub.f32 1.0, %v854_v36  ;;  %869 = vst.msk [vmem:[%s161_s29] sm:$0xff] %vm868_vm7, %v851_v38 }
 0x174   : > { %v856_v41 = vmul.f32 %v1142_v34, %v855_v39 }
 0x176   : > { %v857_v43 = vadd.f32 %v1142_v34, %v856_v41 }
 0x178   : > { %v861_v45 = vsel %vm860_vm11, %v1142_v34, %v857_v43 }
 0x179   : > { %v866_v46 = vsel %vm863_vm12, %v865_v44, %v861_v45 }
 0x17a   : > { %870 = vst.msk [vmem:[%s161_s29 + $0x8] sm:$0xff] %vm868_vm7, %v866_v46 }
 0x17b   : > { %1170 = shalt.err (!%p1167_p5)
}
 0x17c   : > { %s1225_s18 = smov 128   ;;  %s1226_s20 = smov 8  }
 0x17d   : > { %1076 = dma.vmem_to_hbm [thread:$0]  (%p1282_p4), %s885_s12, 256, %s887_s30, %s872_s3, %s1225_s18, %s1225_s18, %s1226_s20  }
 0x17e PF: > { %p1082_p6 = scmp.ge.s32.totalorder %s1221_s14, 2  ;;  %s901_s23 = sand.u32 1, %s1201_s9  }
 0x17f   : > { %s902_s24 = scalar_lea.sflag [#allocation4], %s901_s23 }
 0x180   : > { %p1079_p7 = pnand %p1082_p6, %p1289_p8 }
 0x182   : > { %p1080_p9 = pneg %p1079_p7 }
 0x184   : > { %1196 = dma.done.wait (%p1080_p9), %s902_s24, 256  }
 0x185   : > { %1198 = vsyncadd (%p1080_p9), %s902_s24, 4294967040  ;;  %s15_s14 = sadd.s32 1, %s1221_s14   ;;  %s1528_s9 = smov %s1205_s10 }
 0x186   : > { %p12_p10 = scmp.ge.s32.totalorder %s15_s14, 4   ;;  %s1529_s10 = smov %s1209_s11 }
 0x187   : > { %s1530_s11 = smov %s1295_s22  ;;  %s1531_s12 = smov %s1217_s13 }
 0x188   : > { %s1532_s13 = smov %s1534_s17  ;;  %14 = sbr.rel (!%p12_p10) target bundleno = 4 (0x4), region = 98 }
 0x18d   :  { %908 = vsyncpa [#allocation4], 1 }
 0x18e   :  { %910 = vsyncpa [#allocation4 + $0x1], 1 }

</bundles_post_ra>
